<compile_context>
chip_gen: v5e
topology: v5e:2x2
jax: 0.10.0
libtpu: 0.0.40
codegen_flags: <defaults>
</compile_context>

<pallas_src>
import jax
import jax.numpy as jnp
from jax.experimental import pallas as pl
from jax.experimental.pallas import tpu as pltpu


# Packed-parameter slab layout (rows padded to sublane-tile boundaries of 8):
#   rows  0:5 , cols 0:3 -> W1 (5,3);  rows  0:5 , col 3 -> b1 (5,)
#   rows  8:12, cols 0:5 -> W2 (4,5);  rows  8:12, col 5 -> b2 (4,)
#   rows 16:22, cols 0:4 -> W3 (6,4);  rows 16:22, col 4 -> b3 (6,)
PACKED_SHAPE = (24, 8)

# Max lanes per batch tile: double-buffered in+out streaming buffers at this
# size are ~4 MiB (f32, sublane-padded to 8) — comfortably inside even v7x's
# 32 MiB default scoped / 64 MiB physical VMEM, while making the ~0.35 us
# per-grid-step overhead <1% of the step's HBM time on all generations.
TILE_MAX_LANES = 32768


def pack_params(params):
    p = jnp.zeros(PACKED_SHAPE, jnp.float32)
    p = p.at[0:5, 0:3].set(params["w1"])
    p = p.at[0:5, 3].set(params["b1"])
    p = p.at[8:12, 0:5].set(params["w2"])
    p = p.at[8:12, 5].set(params["b2"])
    p = p.at[16:22, 0:4].set(params["w3"])
    p = p.at[16:22, 4].set(params["b3"])
    return p


def qnetwork_kernel(w_ref, x_ref, out_ref):
    """Fused forward for one batch tile, features-on-sublanes / batch-on-lanes.

    w_ref:   (24, 8)       packed weights+biases, VMEM-resident across the grid
    x_ref:   (3, TILE_B)   state tile (batch on lanes)
    out_ref: (6, TILE_B)   Q-values tile (lane-dense store)
    """
    p = w_ref[...]
    x = x_ref[...]                          # (3, TILE_B) f32

    w1, b1 = p[0:5, 0:3], p[0:5, 3:4]       # (5,3), (5,1)
    w2, b2 = p[8:12, 0:5], p[8:12, 5:6]     # (4,5), (4,1)
    w3, b3 = p[16:22, 0:4], p[16:22, 4:5]   # (6,4), (6,1)

    # Layer 1: h1 = relu(W1 @ x + b1)  -> (5, TILE_B), unrolled VPU FMAs.
    h1 = b1 + w1[:, 0:1] * x[0:1, :]
    for k in range(1, 3):
        h1 = h1 + w1[:, k:k + 1] * x[k:k + 1, :]
    h1 = jnp.maximum(h1, 0.0)

    # Layer 2: h2 = relu(W2 @ h1 + b2) -> (4, TILE_B)
    h2 = b2 + w2[:, 0:1] * h1[0:1, :]
    for k in range(1, 5):
        h2 = h2 + w2[:, k:k + 1] * h1[k:k + 1, :]
    h2 = jnp.maximum(h2, 0.0)

    # Layer 3: out = W3 @ h2 + b3      -> (6, TILE_B)
    h3 = b3 + w3[:, 0:1] * h2[0:1, :]
    for k in range(1, 4):
        h3 = h3 + w3[:, k:k + 1] * h2[k:k + 1, :]

    out_ref[...] = h3.astype(out_ref.dtype)


def qnetwork_forward(state, params, *, tile_max=TILE_MAX_LANES):
    """state: (B, 3) f32  ->  (B, 6) f32 Q-values (PyTorch QNetwork.forward)."""
    B = state.shape[0]

    # --- grid sizing -------------------------------------------------------
    # * big tiles amortize the fixed per-step cost,
    # * >=2 (even) steps let the "parallel" axis shard across v7x's 2 TCs,
    # * tile_b = ceil(B / (n*128)) * 128 keeps padding below n_tiles*128
    #   samples and guarantees b_pad >= B.
    if B <= 128:
        n_tiles = 1
    else:
        n_tiles = max(2, pl.cdiv(B, tile_max))
        n_tiles += n_tiles % 2                      # even -> balanced on 2 TCs
    tile_b = pl.cdiv(B, n_tiles * 128) * 128        # lanes per step, mult of 128
    b_pad = n_tiles * tile_b
    assert b_pad >= B and tile_b <= max(tile_max, 128)

    # --- wrapper layout plumbing ------------------------------------------
    # Batch-on-lanes layout; skip the pad materialization when already aligned.
    if b_pad == B:
        x_t = state.T
    else:
        x_t = jnp.zeros((3, b_pad), jnp.float32).at[:, :B].set(state.T)
    packed = pack_params(params)

    # Double-buffered streaming tiles (sublanes padded to 8) + params + slack.
    vmem_bytes = 2 * 2 * (8 * tile_b * 4) + (4 << 20)

    out_t = pl.pallas_call(
        qnetwork_kernel,
        out_shape=jax.ShapeDtypeStruct((6, b_pad), jnp.float32),
        grid=(n_tiles,),
        in_specs=[
            # Packed params: one tiny DMA, constant block index => stays resident.
            pl.BlockSpec(PACKED_SHAPE, lambda i: (0, 0)),
            # Streamed state tiles, lane-dense.
            pl.BlockSpec((3, tile_b), lambda i: (0, i)),
        ],
        out_specs=pl.BlockSpec((6, tile_b), lambda i: (0, i)),
        compiler_params=pltpu.CompilerParams(
            dimension_semantics=("parallel",),      # shards batch grid across TCs
            vmem_limit_bytes=int(vmem_bytes),
        ),
        cost_estimate=pl.CostEstimate(
            flops=118 * b_pad,                      # 2*(5*3 + 4*5 + 6*4) per sample
            transcendentals=0,
            bytes_accessed=36 * b_pad + 4 * PACKED_SHAPE[0] * PACKED_SHAPE[1],
        ),
    )(packed, x_t)

    return out_t.T if b_pad == B else out_t[:, :B].T


def init_params(key):
    """PyTorch nn.Linear default init: U(-1/sqrt(fan_in), 1/sqrt(fan_in)),
    weights stored in PyTorch (out_features, in_features) layout."""
    def linear_init(k, fan_in, fan_out):
        kw, kb = jax.random.split(k)
        bound = 1.0 / jnp.sqrt(jnp.float32(fan_in))
        w = jax.random.uniform(kw, (fan_out, fan_in), jnp.float32, -bound, bound)
        b = jax.random.uniform(kb, (fan_out,), jnp.float32, -bound, bound)
        return w, b

    k1, k2, k3 = jax.random.split(key, 3)
    w1, b1 = linear_init(k1, 3, 5)
    w2, b2 = linear_init(k2, 5, 4)
    w3, b3 = linear_init(k3, 4, 6)
    return {"w1": w1, "b1": b1, "w2": w2, "b2": b2, "w3": w3, "b3": b3}


def qnetwork_ref(state, params):
    """Pure-JAX reference matching the PyTorch forward exactly."""
    h1 = jnp.maximum(state @ params["w1"].T + params["b1"], 0.0)
    h2 = jnp.maximum(h1 @ params["w2"].T + params["b2"], 0.0)
    return h2 @ params["w3"].T + params["b3"]


if __name__ == "__main__":
    key = jax.random.PRNGKey(0)
    k_params, k_s1, k_s2, k_s3 = jax.random.split(key, 4)
    params = init_params(k_params)

    # Main check: aligned batch -> 2 grid steps (both TCs on v7x), no pad path.
    batch = 1024
    state = jax.random.normal(k_s1, (batch, 3), jnp.float32)
    out = jax.block_until_ready(qnetwork_forward(state, params))
    ref = qnetwork_ref(state, params)
    assert out.shape == (batch, 6), out.shape
    assert jnp.allclose(out, ref, atol=1e-5, rtol=1e-5), "mismatch (batch=1024)"

    # Ragged batch: exercises lane padding + the 2-tile small-tile path.
    small = jax.random.normal(k_s2, (200, 3), jnp.float32)
    out_s = jax.block_until_ready(qnetwork_forward(small, params))
    ref_s = qnetwork_ref(small, params)
    assert out_s.shape == (200, 6), out_s.shape
    assert jnp.allclose(out_s, ref_s, atol=1e-5, rtol=1e-5), "mismatch (batch=200)"

    # Tiny batch: single-tile path (note: at this size a plain jitted jnp
    # forward is preferable to Pallas; kept here only as a correctness check).
    tiny = jax.random.normal(k_s3, (2, 3), jnp.float32)
    out_t = jax.block_until_ready(qnetwork_forward(tiny, params))
    ref_t = qnetwork_ref(tiny, params)
    assert out_t.shape == (2, 6), out_t.shape
    assert jnp.allclose(out_t, ref_t, atol=1e-5, rtol=1e-5), "mismatch (batch=2)"

    print("KERNEL_OK")
</pallas_src>

<mosaic_0001>
module attributes {stable_mosaic.version = 11 : i64} {
  func.func @qnetwork_kernel(%arg0: i32, %arg1: memref<24x8xf32, #tpu.memory_space<vmem>>, %arg2: memref<3x512xf32, #tpu.memory_space<vmem>>, %arg3: memref<6x512xf32, #tpu.memory_space<vmem>>) attributes {dimension_semantics = [#tpu.dimension_semantics<parallel>], iteration_bounds = array<i64: 2>, scalar_prefetch = 0 : i64, scratch_operands = 0 : i64, tpu.core_type = #tpu.core_type<tc>, window_params = [{pipeline_mode = #tpu.pipeline_mode<synchronous>, transform_indices = @transform_0, window_bounds = array<i64: 24, 8>}, {transform_indices = @transform_1, window_bounds = array<i64: 3, 512>}, {transform_indices = @transform_2, window_bounds = array<i64: 6, 512>}]} {
    %c0 = arith.constant 0 : index
    %c0_0 = arith.constant 0 : index
    %0 = vector.load %arg1[%c0, %c0_0] : memref<24x8xf32, #tpu.memory_space<vmem>>, vector<24x8xf32>
    %c0_1 = arith.constant 0 : index
    %c0_2 = arith.constant 0 : index
    %1 = vector.load %arg2[%c0_1, %c0_2] : memref<3x512xf32, #tpu.memory_space<vmem>>, vector<3x512xf32>
    %2 = vector.extract_strided_slice %0 {offsets = [0, 0], sizes = [5, 3], strides = [1, 1]} : vector<24x8xf32> to vector<5x3xf32>
    %3 = vector.extract_strided_slice %0 {offsets = [0, 3], sizes = [5, 1], strides = [1, 1]} : vector<24x8xf32> to vector<5x1xf32>
    %4 = vector.extract_strided_slice %0 {offsets = [8, 0], sizes = [4, 5], strides = [1, 1]} : vector<24x8xf32> to vector<4x5xf32>
    %5 = vector.extract_strided_slice %0 {offsets = [8, 5], sizes = [4, 1], strides = [1, 1]} : vector<24x8xf32> to vector<4x1xf32>
    %6 = vector.extract_strided_slice %0 {offsets = [16, 0], sizes = [6, 4], strides = [1, 1]} : vector<24x8xf32> to vector<6x4xf32>
    %7 = vector.extract_strided_slice %0 {offsets = [16, 4], sizes = [6, 1], strides = [1, 1]} : vector<24x8xf32> to vector<6x1xf32>
    %8 = vector.extract_strided_slice %2 {offsets = [0, 0], sizes = [5, 1], strides = [1, 1]} : vector<5x3xf32> to vector<5x1xf32>
    %9 = vector.extract_strided_slice %1 {offsets = [0, 0], sizes = [1, 512], strides = [1, 1]} : vector<3x512xf32> to vector<1x512xf32>
    %10 = vector.broadcast %8 : vector<5x1xf32> to vector<5x512xf32>
    %11 = vector.broadcast %9 : vector<1x512xf32> to vector<5x512xf32>
    %12 = arith.mulf %10, %11 : vector<5x512xf32>
    %13 = vector.broadcast %3 : vector<5x1xf32> to vector<5x512xf32>
    %14 = arith.addf %13, %12 : vector<5x512xf32>
    %15 = vector.extract_strided_slice %2 {offsets = [0, 1], sizes = [5, 1], strides = [1, 1]} : vector<5x3xf32> to vector<5x1xf32>
    %16 = vector.extract_strided_slice %1 {offsets = [1, 0], sizes = [1, 512], strides = [1, 1]} : vector<3x512xf32> to vector<1x512xf32>
    %17 = vector.broadcast %15 : vector<5x1xf32> to vector<5x512xf32>
    %18 = vector.broadcast %16 : vector<1x512xf32> to vector<5x512xf32>
    %19 = arith.mulf %17, %18 : vector<5x512xf32>
    %20 = arith.addf %14, %19 : vector<5x512xf32>
    %21 = vector.extract_strided_slice %2 {offsets = [0, 2], sizes = [5, 1], strides = [1, 1]} : vector<5x3xf32> to vector<5x1xf32>
    %22 = vector.extract_strided_slice %1 {offsets = [2, 0], sizes = [1, 512], strides = [1, 1]} : vector<3x512xf32> to vector<1x512xf32>
    %23 = vector.broadcast %21 : vector<5x1xf32> to vector<5x512xf32>
    %24 = vector.broadcast %22 : vector<1x512xf32> to vector<5x512xf32>
    %25 = arith.mulf %23, %24 : vector<5x512xf32>
    %26 = arith.addf %20, %25 : vector<5x512xf32>
    %cst = arith.constant 0.000000e+00 : f32
    %27 = vector.broadcast %cst : f32 to vector<5x512xf32>
    %28 = arith.maximumf %26, %27 : vector<5x512xf32>
    %29 = vector.extract_strided_slice %4 {offsets = [0, 0], sizes = [4, 1], strides = [1, 1]} : vector<4x5xf32> to vector<4x1xf32>
    %30 = vector.extract_strided_slice %28 {offsets = [0, 0], sizes = [1, 512], strides = [1, 1]} : vector<5x512xf32> to vector<1x512xf32>
    %31 = vector.broadcast %29 : vector<4x1xf32> to vector<4x512xf32>
    %32 = vector.broadcast %30 : vector<1x512xf32> to vector<4x512xf32>
    %33 = arith.mulf %31, %32 : vector<4x512xf32>
    %34 = vector.broadcast %5 : vector<4x1xf32> to vector<4x512xf32>
    %35 = arith.addf %34, %33 : vector<4x512xf32>
    %36 = vector.extract_strided_slice %4 {offsets = [0, 1], sizes = [4, 1], strides = [1, 1]} : vector<4x5xf32> to vector<4x1xf32>
    %37 = vector.extract_strided_slice %28 {offsets = [1, 0], sizes = [1, 512], strides = [1, 1]} : vector<5x512xf32> to vector<1x512xf32>
    %38 = vector.broadcast %36 : vector<4x1xf32> to vector<4x512xf32>
    %39 = vector.broadcast %37 : vector<1x512xf32> to vector<4x512xf32>
    %40 = arith.mulf %38, %39 : vector<4x512xf32>
    %41 = arith.addf %35, %40 : vector<4x512xf32>
    %42 = vector.extract_strided_slice %4 {offsets = [0, 2], sizes = [4, 1], strides = [1, 1]} : vector<4x5xf32> to vector<4x1xf32>
    %43 = vector.extract_strided_slice %28 {offsets = [2, 0], sizes = [1, 512], strides = [1, 1]} : vector<5x512xf32> to vector<1x512xf32>
    %44 = vector.broadcast %42 : vector<4x1xf32> to vector<4x512xf32>
    %45 = vector.broadcast %43 : vector<1x512xf32> to vector<4x512xf32>
    %46 = arith.mulf %44, %45 : vector<4x512xf32>
    %47 = arith.addf %41, %46 : vector<4x512xf32>
    %48 = vector.extract_strided_slice %4 {offsets = [0, 3], sizes = [4, 1], strides = [1, 1]} : vector<4x5xf32> to vector<4x1xf32>
    %49 = vector.extract_strided_slice %28 {offsets = [3, 0], sizes = [1, 512], strides = [1, 1]} : vector<5x512xf32> to vector<1x512xf32>
    %50 = vector.broadcast %48 : vector<4x1xf32> to vector<4x512xf32>
    %51 = vector.broadcast %49 : vector<1x512xf32> to vector<4x512xf32>
    %52 = arith.mulf %50, %51 : vector<4x512xf32>
    %53 = arith.addf %47, %52 : vector<4x512xf32>
    %54 = vector.extract_strided_slice %4 {offsets = [0, 4], sizes = [4, 1], strides = [1, 1]} : vector<4x5xf32> to vector<4x1xf32>
    %55 = vector.extract_strided_slice %28 {offsets = [4, 0], sizes = [1, 512], strides = [1, 1]} : vector<5x512xf32> to vector<1x512xf32>
    %56 = vector.broadcast %54 : vector<4x1xf32> to vector<4x512xf32>
    %57 = vector.broadcast %55 : vector<1x512xf32> to vector<4x512xf32>
    %58 = arith.mulf %56, %57 : vector<4x512xf32>
    %59 = arith.addf %53, %58 : vector<4x512xf32>
    %cst_3 = arith.constant 0.000000e+00 : f32
    %60 = vector.broadcast %cst_3 : f32 to vector<4x512xf32>
    %61 = arith.maximumf %59, %60 : vector<4x512xf32>
    %62 = vector.extract_strided_slice %6 {offsets = [0, 0], sizes = [6, 1], strides = [1, 1]} : vector<6x4xf32> to vector<6x1xf32>
    %63 = vector.extract_strided_slice %61 {offsets = [0, 0], sizes = [1, 512], strides = [1, 1]} : vector<4x512xf32> to vector<1x512xf32>
    %64 = vector.broadcast %62 : vector<6x1xf32> to vector<6x512xf32>
    %65 = vector.broadcast %63 : vector<1x512xf32> to vector<6x512xf32>
    %66 = arith.mulf %64, %65 : vector<6x512xf32>
    %67 = vector.broadcast %7 : vector<6x1xf32> to vector<6x512xf32>
    %68 = arith.addf %67, %66 : vector<6x512xf32>
    %69 = vector.extract_strided_slice %6 {offsets = [0, 1], sizes = [6, 1], strides = [1, 1]} : vector<6x4xf32> to vector<6x1xf32>
    %70 = vector.extract_strided_slice %61 {offsets = [1, 0], sizes = [1, 512], strides = [1, 1]} : vector<4x512xf32> to vector<1x512xf32>
    %71 = vector.broadcast %69 : vector<6x1xf32> to vector<6x512xf32>
    %72 = vector.broadcast %70 : vector<1x512xf32> to vector<6x512xf32>
    %73 = arith.mulf %71, %72 : vector<6x512xf32>
    %74 = arith.addf %68, %73 : vector<6x512xf32>
    %75 = vector.extract_strided_slice %6 {offsets = [0, 2], sizes = [6, 1], strides = [1, 1]} : vector<6x4xf32> to vector<6x1xf32>
    %76 = vector.extract_strided_slice %61 {offsets = [2, 0], sizes = [1, 512], strides = [1, 1]} : vector<4x512xf32> to vector<1x512xf32>
    %77 = vector.broadcast %75 : vector<6x1xf32> to vector<6x512xf32>
    %78 = vector.broadcast %76 : vector<1x512xf32> to vector<6x512xf32>
    %79 = arith.mulf %77, %78 : vector<6x512xf32>
    %80 = arith.addf %74, %79 : vector<6x512xf32>
    %81 = vector.extract_strided_slice %6 {offsets = [0, 3], sizes = [6, 1], strides = [1, 1]} : vector<6x4xf32> to vector<6x1xf32>
    %82 = vector.extract_strided_slice %61 {offsets = [3, 0], sizes = [1, 512], strides = [1, 1]} : vector<4x512xf32> to vector<1x512xf32>
    %83 = vector.broadcast %81 : vector<6x1xf32> to vector<6x512xf32>
    %84 = vector.broadcast %82 : vector<1x512xf32> to vector<6x512xf32>
    %85 = arith.mulf %83, %84 : vector<6x512xf32>
    %86 = arith.addf %80, %85 : vector<6x512xf32>
    %c0_4 = arith.constant 0 : index
    %c0_5 = arith.constant 0 : index
    %87 = vector.load %arg3[%c0_4, %c0_5] : memref<6x512xf32, #tpu.memory_space<vmem>>, vector<6x512xf32>
    tpu.vector_store %arg3[%c0_4, %c0_5], %86 {strides = array<i32>} : memref<6x512xf32, #tpu.memory_space<vmem>>, vector<6x512xf32>,
    return
  }
  func.func @transform_0(%arg0: i32) -> (i32, i32) {
    %c0_i32 = arith.constant 0 : i32
    %c0_i32_0 = arith.constant 0 : i32
    %c0_i32_1 = arith.constant 0 : i32
    return %c0_i32, %c0_i32_0 : i32, i32
  }
  func.func @transform_1(%arg0: i32) -> (i32, i32) {
    %c0_i32 = arith.constant 0 : i32
    %c0_i32_0 = arith.constant 0 : i32
    return %c0_i32, %arg0 : i32, i32
  }
  func.func @transform_2(%arg0: i32) -> (i32, i32) {
    %c0_i32 = arith.constant 0 : i32
    %c0_i32_0 = arith.constant 0 : i32
    return %c0_i32, %arg0 : i32, i32
  }
}

</mosaic_0001>

<bundles_post_ra>
// kernel: tpu_custom_call.1
= control target key start
LH: loop header
LB: loop body
LE: loop exit
PB: predicated region body
PF: predicated region fallthrough
CT: control target
= control target key end

     0   :  { %7 = vsyncpa [#allocation3], 0  ;;  %s732_s0 = inlined_call_operand.vmem [shape: f32[24,8], index: 0, kind: input, shape index: {}]   ;;  %s733_s1 = inlined_call_operand.vmem [shape: f32[3,1024], index: 1, kind: input, shape index: {}]   ;;  %s734_s2 = inlined_call_operand.hbm [shape: f32[6,1024], index: 2, kind: output, shape index: {}]  }
   0x1   :  { %9 = vsyncpa [#allocation3 + $0x1], 0  ;;  %s629_s9 = smov 0   ;;  %s631_s10 = smov 0  }
   0x2   :  { %s633_s11 = smov 0   ;;  %s635_s12 = smov 0  }
   0x3 LB: > { %s650_s13 = sadd.s32 4294967295, %s606_s12   ;;  %s471_s14 = sadd.s32 4294967294, %s606_s12   ;;  %s606_s12 = sphi %s635_s12, %s740_s12   ;;  %s602_s11 = sphi %s633_s11, %s739_s11   ;;  %s598_s10 = sphi %s631_s10, %s738_s10   ;;  %s594_s9 = sphi %s629_s9, %s737_s9  }
   0x4   : > { %s654_s15 = sadd.s32 1, %s606_s12   ;;  %s69_s16 = sadd.s32 1, %s602_s11 }
   0x5   : > { %s66_s17 = ssub.s32 %s606_s12, %s654_s15  ;;  %p79_p0 = scmp.ne.s32.totalorder %s602_s11, %s598_s10 }
   0x6   : > { %p67_p1 = scmp.eq.s32.totalorder %s66_s17, 0  ;;  %p80_p2 = scmp.eq.s32.totalorder %s650_s13, 1 }
   0x7   : > { %p85_p3 = scmp.ne.s32.totalorder %s598_s10, %s594_s9  ;;  %p86_p4 = scmp.eq.s32.totalorder %s471_s14, 1 }
   0x8   : > { %s665_s18 = scalar_select %p67_p1, %s602_s11, %s69_s16  }
   0x9   : > { %p667_p5 = por %p80_p2, %p79_p0  ;;  %p671_p6 = por %p86_p4, %p85_p3 }
   0xa   : > { %p474_p7 = scmp.ge.s32.totalorder %s606_s12, 1  ;;  %p116_p8 = scmp.lt.s32.totalorder %s606_s12, 3 }
   0xc   : > { %p117_p9 = pnand %p474_p7, %p116_p8 }
   0xd   : > { %s476_s27 = sshll.u32 (!%p117_p9), %s650_s13, 2  ;;  %s135_s4 = sand.u32 (!%p117_p9), 1, %s598_s10  }
   0xe   : > { %120 = sbr.rel (%p117_p9) target bundleno = 192 (0xc0), region = 28  ;;  %p139_p10 = scmp.lt.s32.totalorder (!%p117_p9), %s476_s27, 7 }
   0xf   : > { %s475_s5 = sshll.u32 (!%p117_p9), %s135_s4, 5  ;;  %s483_s6 = sshll.u32 (!%p117_p9), %s650_s13, 5 }
  0x10   : > { %s407_s14 = scalar_lea.hbm (!%p117_p9), %s734_s2, %s483_s6  ;;  %s137_s13 = scalar_lea.vmem (!%p117_p9), [#allocation2], %s475_s5 }
  0x11   : > { %s409_s16 = sshll.u32 (!%p117_p9), %s137_s13, 4  ;;  %s411_s17 = sshll.u32 (!%p117_p9), %s407_s14, 4  ;;  %s410_s16 = int_to_ptr.vmem [resolvable:$true] %s409_s16  ;;  %s412_s17 = int_to_ptr.hbm [resolvable:$true] %s411_s17 }
  0x12   : > { %s396_s21 = scalar_lea.sflag (!%p117_p9), [#allocation3], %s135_s4  ;;  %s558_s22 = sshra.s32 (!%p117_p9), %s412_s17, 4  ;;  %s559_s22 = int_to_ptr.hbm [resolvable:$true] %s558_s22 }
  0x13   : > { %v145_v0 = vld [vmem:[%s732_s0] sm:$0xff]  ;;  %v608_v1 = vmov 1   ;;  %v609_v2 = vmov 0   ;;  %v146_v3 = vld [vmem:[%s732_s0 + $0x8] sm:$0xff]  ;;  %v610_v4 = vmov 2   ;;  %v611_v5 = vmov 3   ;;  %p565_p0 = scmp.lt.s32.totalorder %s559_s22, %s734_s2 }
  0x14   : > { %531 = vset.pattern.permute.xlu1 %v608_v1  ;;  %529 = vset.pattern.permute.xlu0 %v609_v2  ;;  %v612_v6 = vmov 5   ;;  %v147_v7 = vld [vmem:[%s732_s0 + $0x10] sm:$0xff]  ;;  %v613_v8 = vmov 4   ;;  %s742_s27 = smov (!%p139_p10, %s476_s27), 7  ;;  %s560_s23 = scalar_lea.hbm %s559_s22, 32 }
  0x15   : > { %182 = vperm.xlu1 %531, %v145_v0   ;;  %152 = vperm.xlu0 %529, %v145_v0   ;;  %s477_s28 = sshll.u32 %s742_s27, 2  ;;  %p561_p11 = scmp.ne.s32.totalorder %s559_s22, %s560_s23 }
  0x16   : > { %533 = vset.pattern.permute.xlu2 %v609_v2  ;;  %s142_s3 = scalar_lea.vmem %s733_s1, %s477_s28  ;;  %s564_s26 = scalar_lea.hbm %s734_s2, 64 }
  0x17   : > { %235 = vperm.xlu2 %533, %v146_v3   ;;  %v148_v10 = vld [vmem:[%s142_s3] sm:$0x77]  ;;  %v149_v11 = vld [vmem:[%s142_s3 + $0x8] sm:$0x77]  ;;  %p562_p12 = pnand %p561_p11, %p667_p5  ;;  %p566_p1 = scmp.lt.s32.totalorder %s564_s26, %s560_s23 }
  0x18   : > { %v157_v14 = vperm.slane %v148_v10, 0  ;;  %v158_v15 = vperm.slane %v148_v10, 4  ;;  %v159_v16 = vperm.slane %v149_v11, 0  ;;  %v160_v17 = vperm.slane %v149_v11, 4 }
  0x19   : > { %v185_v18 = vperm.slane %v148_v10, 1  ;;  %v186_v19 = vperm.slane %v148_v10, 5  ;;  %v187_v20 = vperm.slane %v149_v11, 1  ;;  %v188_v21 = vperm.slane %v149_v11, 5  ;;  %p563_p13 = pneg %p562_p12  ;;  %p567_p2 = por %p566_p1, %p565_p0 }
  0x1a   : > { %v209_v22 = vperm.slane %v148_v10, 2  ;;  %v210_v23 = vperm.slane %v148_v10, 6  ;;  %v211_v24 = vperm.slane %v149_v11, 2  ;;  %v212_v25 = vperm.slane %v149_v11, 6 }
  0x1b   : > { %v165_v26 = vperm.slane %v157_v14, 0  ;;  %v166_v27 = vperm.slane %v158_v15, 0  ;;  %v167_v28 = vperm.slane %v159_v16, 0  ;;  %v168_v29 = vperm.slane %v160_v17, 0  ;;  %p568_p3 = pnand %p567_p2, %p563_p13 }
  0x1c   : > { %v193_v30 = vperm.slane %v185_v18, 1  ;;  %v194_v31 = vperm.slane %v186_v19, 1  ;;  %v195_v32 = vperm.slane %v187_v20, 1  ;;  %v196_v33 = vperm.slane %v188_v21, 1 }
  0x1d   : > { %532 = vset.pattern.permute.xlu1 %v610_v4  ;;  %530 = vset.pattern.permute.xlu0 %v611_v5  ;;  %v217_v34 = vperm.slane %v209_v22, 2  ;;  %v218_v35 = vperm.slane %v210_v23, 2  ;;  %v219_v36 = vperm.slane %v211_v24, 2  ;;  %v220_v37 = vperm.slane %v212_v25, 2 }
  0x1e   : > { %206 = vperm.xlu1 %532, %v145_v0   ;;  %174 = vperm.xlu0 %530, %v145_v0  }
  0x1f   : > { %534 = vset.pattern.permute.xlu2 %v612_v6 }
  0x20   : > { %247 = vperm.xlu2 %534, %v146_v3  }
  0x26   : > { %535 = vset.pattern.permute.xlu1 %v608_v1  ;;  %287 = vperm.xlu0 %530, %v146_v3  }
  0x27   : > { %255 = vperm.xlu1 %535, %v146_v3  }
  0x28   : > { %536 = vset.pattern.permute.xlu2 %v610_v4 }
  0x29   : > { %271 = vperm.xlu2 %536, %v146_v3  }
  0x2e   : > { %539 = vset.pattern.permute.xlu0 %v613_v8 }
  0x2f   : > { %537 = vset.pattern.permute.xlu1 %v613_v8  ;;  %336 = vperm.xlu0 %539, %v147_v7  }
  0x30   : > { %303 = vperm.xlu1 %537, %v146_v3  }
  0x31   : > { %538 = vset.pattern.permute.xlu2 %v609_v2 }
  0x32   : > { %324 = vperm.xlu2 %538, %v147_v7  }
  0x37   : > { %543 = vset.pattern.permute.xlu0 %v611_v5 }
  0x38   : > { %540 = vset.pattern.permute.xlu1 %v608_v1 }
  0x39   : > { %344 = vperm.xlu1 %540, %v147_v7  }
  0x3a   : > { %541 = vset.pattern.permute.xlu2 %v610_v4 }
  0x3b   : > { %360 = vperm.xlu2 %541, %v147_v7  }
  0x41   : > { %542 = vset.pattern.permute.xlu1 %v611_v5 }
  0x42   : > { %376 = vperm.xlu1 %542, %v147_v7  }
  0x71   : > { %v690_v9 = vpop.permute.xlu2 %235 }
  0x7a   : > { %v248_v38 = vpop.permute.xlu2 %247 }
  0x83   : > { %v272_v6 = vpop.permute.xlu2 %271 }
  0x87   : > { %v183_v12 = vpop.permute.xlu1 %182  ;;  %v153_v13 = vpop.permute.xlu0 %152 }
  0x88   : > { %v169_v39 = vmul.f32 %v165_v26, %v153_v13  ;;  %v170_v40 = vmul.f32 %v166_v27, %v153_v13  ;;  %v171_v41 = vmul.f32 %v167_v28, %v153_v13  ;;  %v172_v42 = vmul.f32 %v168_v29, %v153_v13 }
  0x89   : > { %v197_v45 = vmul.f32 %v193_v30, %v183_v12  ;;  %v198_v46 = vmul.f32 %v194_v31, %v183_v12  ;;  %v199_v47 = vmul.f32 %v195_v32, %v183_v12  ;;  %v200_v48 = vmul.f32 %v196_v33, %v183_v12 }
  0x90   : > { %v207_v43 = vpop.permute.xlu1 %206  ;;  %v175_v44 = vpop.permute.xlu0 %174 }
  0x91   : > { %v177_v49 = vadd.f32 %v175_v44, %v169_v39  ;;  %v178_v50 = vadd.f32 %v175_v44, %v170_v40  ;;  %v179_v51 = vadd.f32 %v175_v44, %v171_v41  ;;  %v180_v52 = vadd.f32 %v175_v44, %v172_v42 }
  0x92   : > { %v221_v53 = vmul.f32 %v217_v34, %v207_v43  ;;  %v222_v54 = vmul.f32 %v218_v35, %v207_v43  ;;  %v223_v55 = vmul.f32 %v219_v36, %v207_v43  ;;  %v224_v56 = vmul.f32 %v220_v37, %v207_v43 }
  0x93   : > { %v201_v57 = vadd.f32 %v197_v45, %v177_v49  ;;  %v202_v58 = vadd.f32 %v198_v46, %v178_v50  ;;  %v203_v59 = vadd.f32 %v199_v47, %v179_v51  ;;  %v204_v60 = vadd.f32 %v200_v48, %v180_v52  ;;  %v325_v49 = vpop.permute.xlu2 %324 }
  0x95   : > { %v225_v61 = vadd.f32 %v221_v53, %v201_v57  ;;  %v226_v62 = vadd.f32 %v222_v54, %v202_v58  ;;  %v227_v63 = vadd.f32 %v223_v55, %v203_v59  ;;  %v228_v0 = vadd.f32 %v224_v56, %v204_v60 }
  0x97   : > { %v229_v1 = vmax.f32 %v225_v61, 0.0  ;;  %v230_v2 = vmax.f32 %v226_v62, 0.0  ;;  %v231_v3 = vmax.f32 %v227_v63, 0.0  ;;  %v232_v4 = vmax.f32 %v228_v0, 0.0 }
  0x98   : > { %v288_v20 = vpop.permute.xlu0 %287 }
  0x99   : > { %v256_v5 = vpop.permute.xlu1 %255  ;;  %v238_v7 = vperm.slane %v229_v1, 0  ;;  %v239_v8 = vperm.slane %v230_v2, 0  ;;  %v240_v10 = vperm.slane %v231_v3, 0  ;;  %v241_v11 = vperm.slane %v232_v4, 0 }
  0x9a   : > { %v290_v12 = vperm.slane %v229_v1, 3  ;;  %v291_v13 = vperm.slane %v230_v2, 3  ;;  %v292_v14 = vperm.slane %v231_v3, 3  ;;  %v293_v15 = vperm.slane %v232_v4, 3 }
  0x9b   : > { %v242_v16 = vmul.f32 %v238_v7, %v690_v9  ;;  %v243_v17 = vmul.f32 %v239_v8, %v690_v9  ;;  %v244_v18 = vmul.f32 %v240_v10, %v690_v9  ;;  %v245_v19 = vmul.f32 %v241_v11, %v690_v9 }
  0x9c   : > { %v294_v21 = vmul.f32 %v290_v12, %v288_v20  ;;  %v295_v22 = vmul.f32 %v291_v13, %v288_v20  ;;  %v296_v23 = vmul.f32 %v292_v14, %v288_v20  ;;  %v297_v24 = vmul.f32 %v293_v15, %v288_v20  ;;  %v361_v12 = vpop.permute.xlu2 %360 }
  0x9d   : > { %v250_v25 = vadd.f32 %v248_v38, %v242_v16  ;;  %v251_v26 = vadd.f32 %v248_v38, %v243_v17  ;;  %v252_v27 = vadd.f32 %v248_v38, %v244_v18  ;;  %v253_v28 = vadd.f32 %v248_v38, %v245_v19 }
  0x9e   : > { %v258_v29 = vperm.slane %v229_v1, 1  ;;  %v259_v30 = vperm.slane %v230_v2, 1  ;;  %v260_v31 = vperm.slane %v231_v3, 1  ;;  %v261_v32 = vperm.slane %v232_v4, 1 }
  0x9f   : > { %v274_v33 = vperm.slane %v229_v1, 2  ;;  %v275_v34 = vperm.slane %v230_v2, 2  ;;  %v276_v35 = vperm.slane %v231_v3, 2  ;;  %v277_v36 = vperm.slane %v232_v4, 2 }
  0xa0   : > { %v262_v37 = vmul.f32 %v258_v29, %v256_v5  ;;  %v263_v39 = vmul.f32 %v259_v30, %v256_v5  ;;  %v264_v9 = vmul.f32 %v260_v31, %v256_v5  ;;  %v265_v40 = vmul.f32 %v261_v32, %v256_v5 }
  0xa1   : > { %v278_v41 = vmul.f32 %v274_v33, %v272_v6  ;;  %v279_v42 = vmul.f32 %v275_v34, %v272_v6  ;;  %v280_v43 = vmul.f32 %v276_v35, %v272_v6  ;;  %v281_v44 = vmul.f32 %v277_v36, %v272_v6  ;;  %v337_v31 = vpop.permute.xlu0 %336 }
  0xa2   : > { %v304_v45 = vpop.permute.xlu1 %303  ;;  %v266_v46 = vadd.f32 %v262_v37, %v250_v25  ;;  %v267_v47 = vadd.f32 %v263_v39, %v251_v26  ;;  %v268_v38 = vadd.f32 %v264_v9, %v252_v27  ;;  %v269_v48 = vadd.f32 %v265_v40, %v253_v28 }
  0xa3   : > { %v306_v50 = vperm.slane %v229_v1, 4  ;;  %v307_v51 = vperm.slane %v230_v2, 4  ;;  %v308_v52 = vperm.slane %v231_v3, 4  ;;  %v309_v53 = vperm.slane %v232_v4, 4 }
  0xa4   : > { %v282_v54 = vadd.f32 %v278_v41, %v266_v46  ;;  %v283_v55 = vadd.f32 %v279_v42, %v267_v47  ;;  %v284_v56 = vadd.f32 %v280_v43, %v268_v38  ;;  %v285_v57 = vadd.f32 %v281_v44, %v269_v48 }
  0xa5   : > { %v310_v58 = vmul.f32 %v306_v50, %v304_v45  ;;  %v311_v59 = vmul.f32 %v307_v51, %v304_v45  ;;  %v312_v60 = vmul.f32 %v308_v52, %v304_v45  ;;  %v313_v61 = vmul.f32 %v309_v53, %v304_v45 }
  0xa6   : > { %v298_v62 = vadd.f32 %v294_v21, %v282_v54  ;;  %v299_v63 = vadd.f32 %v295_v22, %v283_v55  ;;  %v300_v0 = vadd.f32 %v296_v23, %v284_v56  ;;  %v301_v5 = vadd.f32 %v297_v24, %v285_v57 }
  0xa8   : > { %v314_v6 = vadd.f32 %v310_v58, %v298_v62  ;;  %v315_v7 = vadd.f32 %v311_v59, %v299_v63  ;;  %v316_v8 = vadd.f32 %v312_v60, %v300_v0  ;;  %v317_v10 = vadd.f32 %v313_v61, %v301_v5 }
  0xaa   : > { %v318_v1 = vmax.f32 %v314_v6, 0.0  ;;  %v319_v2 = vmax.f32 %v315_v7, 0.0  ;;  %v320_v3 = vmax.f32 %v316_v8, 0.0  ;;  %v321_v4 = vmax.f32 %v317_v10, 0.0 }
  0xab   : > { %v345_v11 = vpop.permute.xlu1 %344 }
  0xac   : > { %v363_v13 = vperm.slane %v318_v1, 2  ;;  %v364_v14 = vperm.slane %v319_v2, 2  ;;  %v347_v15 = vperm.slane %v318_v1, 1  ;;  %v348_v16 = vperm.slane %v319_v2, 1 }
  0xad   : > { %v349_v17 = vperm.slane %v320_v3, 1  ;;  %v350_v18 = vperm.slane %v321_v4, 1  ;;  %v365_v19 = vperm.slane %v320_v3, 2  ;;  %v366_v20 = vperm.slane %v321_v4, 2 }
  0xae   : > { %v367_v21 = vmul.f32 %v363_v13, %v361_v12  ;;  %v368_v22 = vmul.f32 %v364_v14, %v361_v12  ;;  %v327_v23 = vperm.slane %v318_v1, 0  ;;  %v328_v24 = vperm.slane %v319_v2, 0 }
  0xaf   : > { %v329_v25 = vperm.slane %v320_v3, 0  ;;  %v330_v26 = vperm.slane %v321_v4, 0  ;;  %v351_v27 = vmul.f32 %v347_v15, %v345_v11  ;;  %v352_v28 = vmul.f32 %v348_v16, %v345_v11 }
  0xb0   : > { %v353_v29 = vmul.f32 %v349_v17, %v345_v11  ;;  %v354_v30 = vmul.f32 %v350_v18, %v345_v11  ;;  %v331_v32 = vmul.f32 %v327_v23, %v325_v49  ;;  %v332_v33 = vmul.f32 %v328_v24, %v325_v49 }
  0xb1   : > { %v333_v34 = vmul.f32 %v329_v25, %v325_v49  ;;  %v334_v35 = vmul.f32 %v330_v26, %v325_v49  ;;  %v369_v36 = vmul.f32 %v365_v19, %v361_v12  ;;  %v379_v39 = vperm.slane %v318_v1, 3 }
  0xb2   : > { %v380_v9 = vperm.slane %v319_v2, 3  ;;  %v381_v40 = vperm.slane %v320_v3, 3  ;;  %v339_v41 = vadd.f32 %v337_v31, %v331_v32  ;;  %v340_v42 = vadd.f32 %v337_v31, %v332_v33 }
  0xb3   : > { %v341_v43 = vadd.f32 %v337_v31, %v333_v34  ;;  %v342_v44 = vadd.f32 %v337_v31, %v334_v35  ;;  %v382_v45 = vperm.slane %v321_v4, 3  ;;  %v370_v52 = vmul.f32 %v366_v20, %v361_v12 }
  0xb4   : > { %v377_v37 = vpop.permute.xlu1 %376  ;;  %v355_v48 = vadd.f32 %v351_v27, %v339_v41  ;;  %v356_v50 = vadd.f32 %v352_v28, %v340_v42 }
  0xb5   : > { %v383_v46 = vmul.f32 %v379_v39, %v377_v37  ;;  %v384_v47 = vmul.f32 %v380_v9, %v377_v37  ;;  %v385_v38 = vmul.f32 %v381_v40, %v377_v37  ;;  %v357_v51 = vadd.f32 %v353_v29, %v341_v43 }
  0xb6   : > { %v358_v49 = vadd.f32 %v354_v30, %v342_v44  ;;  %v386_v53 = vmul.f32 %v382_v45, %v377_v37  ;;  %v371_v54 = vadd.f32 %v367_v21, %v355_v48  ;;  %v372_v55 = vadd.f32 %v368_v22, %v356_v50 }
  0xb7   : > { %v373_v56 = vadd.f32 %v369_v36, %v357_v51 }
  0xb8   : > { %v374_v57 = vadd.f32 %v370_v52, %v358_v49  ;;  %v387_v58 = vadd.f32 %v383_v46, %v371_v54  ;;  %v388_v59 = vadd.f32 %v384_v47, %v372_v55 }
  0xb9   : > { %v389_v60 = vadd.f32 %v385_v38, %v373_v56 }
  0xba   : > { %v390_v61 = vadd.f32 %v386_v53, %v374_v57  ;;  %391 = vst [vmem:[%s137_s13] sm:$0x3f] %v387_v58 }
  0xbb   : > { %392 = vst [vmem:[%s137_s13 + $0x8] sm:$0x3f] %v388_v59 }
  0xbc   : > { %393 = vst [vmem:[%s137_s13 + $0x10] sm:$0x3f] %v389_v60 }
  0xbd   : > { %394 = vst [vmem:[%s137_s13 + $0x18] sm:$0x3f] %v390_v61 }
  0xbe   : > { %571 = shalt.err (!%p568_p3)
}
  0xbf   : > { %484 = dma.vmem_to_hbm [thread:$0]  (%p667_p5), %s410_s16, 512, %s412_s17, %s396_s21  }
  0xc0 PF: > { %p490_p4 = scmp.ge.s32.totalorder %s606_s12, 2  ;;  %s423_s29 = sand.u32 1, %s594_s9  }
  0xc1   : > { %s424_s30 = scalar_lea.sflag [#allocation3], %s423_s29 }
  0xc2   : > { %p487_p7 = pnand %p490_p4, %p671_p6 }
  0xc4   : > { %p488_p8 = pneg %p487_p7 }
  0xc6   : > { %589 = dma.done.wait (%p488_p8), %s424_s30, 512  }
  0xc7   : > { %591 = vsyncadd (%p488_p8), %s424_s30, 4294966784  ;;  %p12_p9 = scmp.ge.s32.totalorder %s654_s15, 4   ;;  %s737_s9 = smov %s598_s10 }
  0xc8   : > { %s738_s10 = smov %s602_s11  ;;  %s739_s11 = smov %s665_s18 }
  0xc9   : > { %s740_s12 = smov %s654_s15  ;;  %14 = sbr.rel (!%p12_p9) target bundleno = 3 (0x3), region = 63 }
  0xce   :  { %430 = vsyncpa [#allocation3], 1 }
  0xcf   :  { %432 = vsyncpa [#allocation3 + $0x1], 1 }

</bundles_post_ra>
